<compile_context>
chip_gen: v6e
topology: v6e:2x2x1
jax: 0.10.0
libtpu: 0.0.40
codegen_flags: <defaults>
</compile_context>

<pallas_src>
import functools

import jax
import jax.numpy as jnp
from jax.experimental import pallas as pl
from jax.experimental.pallas import tpu as pltpu

_LANE = 128
_SUBLANE = 8


def _round_up(v, m):
    return (v + m - 1) // m * m


def _vmem_capacity_bytes():
    """Generation-aware VMEM capacity; conservative fallback if unavailable."""
    try:
        info = pltpu.get_tpu_info()
        cap = getattr(info, "vmem_capacity_bytes", None)
        if cap:
            return int(cap)
    except Exception:
        pass
    return 64 * 2 ** 20  # v7x per-TC size as the safe lower bound


def _mlp_kernel(*refs, num_weights):
    # refs = (x_ref, w_ref_0, ..., w_ref_{k-1}, o_ref)
    x_ref = refs[0]
    w_refs = refs[1:1 + num_weights]
    o_ref = refs[1 + num_weights]

    compute_dtype = x_ref.dtype
    h = x_ref[...]                                   # (TM, C0) compute dtype
    for i, w_ref in enumerate(w_refs):
        acc = jnp.dot(h, w_ref[...], preferred_element_type=jnp.float32)
        if i < num_weights - 1:                      # ReLU between layers
            h = jnp.maximum(acc, 0.0).astype(compute_dtype)
        else:
            h = acc                                  # keep f32 accumulation
    o_ref[...] = h.astype(o_ref.dtype)


def pad_weights(weights, compute_dtype=jnp.bfloat16, lane=_LANE):
    """Pad/cast weights once (hoisted out of the per-call path).

    Zero-padding is numerically exact: padded input cols hit zero weight rows,
    padded output cols come from zero weight cols, and ReLU(0) = 0.
    """
    if len(weights) < 1:
        raise ValueError("tabular needs depth >= 2 (at least one weight matrix)")
    dims = [int(weights[0].shape[0])] + [int(w.shape[1]) for w in weights]
    for i in range(len(weights) - 1):
        assert weights[i].shape[1] == weights[i + 1].shape[0]
    dims_p = [_round_up(d, lane) for d in dims]
    w_ps = []
    for i, w in enumerate(weights):
        wp = w.astype(compute_dtype)
        pr, pc = dims_p[i] - dims[i], dims_p[i + 1] - dims[i + 1]
        if pr or pc:
            wp = jnp.pad(wp, ((0, pr), (0, pc)))
        w_ps.append(wp)
    return w_ps, dims, dims_p


def _pick_tile_m(n, dims_p, itemsize, out_itemsize, num_w, vmem_cap):
    max_d = max(dims_p)
    if max_d <= 512:
        tm = 2048
    elif max_d <= 1024:
        tm = 1024
    elif max_d <= 2048:
        tm = 512
    else:
        tm = 256
    # Keep x tile + out tile + f32 activations within VMEM left after weights.
    w_bytes = sum(dims_p[i] * dims_p[i + 1] for i in range(num_w)) * itemsize
    per_row = (3 * dims_p[0] * itemsize
               + 2 * dims_p[-1] * out_itemsize
               + 2 * max_d * 4)
    budget = int(0.7 * vmem_cap) - w_bytes
    if budget > per_row * _SUBLANE:
        tm = min(tm, max(_SUBLANE, budget // per_row // _SUBLANE * _SUBLANE))
    # Clamp to the (sublane-rounded) batch.
    tm = max(_SUBLANE, min(tm, _round_up(n, _SUBLANE)))
    # Prefer >= 2 grid steps when the batch allows it (v7x: 2 TensorCores).
    while tm > _SUBLANE and -(-n // tm) < 2:
        tm = _round_up(tm // 2, _SUBLANE)
    return tm


def tabular_forward(x, weights=None, *, prepared=None, tile_m=None,
                    compute_dtype=jnp.bfloat16, lane=_LANE, out_dtype=None,
                    squeeze_output=True):
    """x: [N, input_shape].  Either raw `weights` (list of [in_i, out_i], i.e.
    torch conv1x1 W transposed) or `prepared` = pad_weights(...) output."""
    if prepared is None:
        prepared = pad_weights(weights, compute_dtype=compute_dtype, lane=lane)
    w_ps, dims, dims_p = prepared
    compute_dtype = w_ps[0].dtype
    if out_dtype is None:
        out_dtype = compute_dtype           # narrow HBM store stream by default
    num_w = len(w_ps)

    n, c_in = x.shape
    assert c_in == dims[0], (c_in, dims[0])
    out_dim = dims[-1]

    itemsize = jnp.dtype(compute_dtype).itemsize
    out_itemsize = jnp.dtype(out_dtype).itemsize
    vmem_cap = _vmem_capacity_bytes()

    if tile_m is None:
        tile_m = _pick_tile_m(n, dims_p, itemsize, out_itemsize, num_w, vmem_cap)
    else:
        tile_m = max(_SUBLANE, min(_round_up(tile_m, _SUBLANE),
                                   _round_up(n, _SUBLANE)))
    n_p = _round_up(n, tile_m)
    grid = (n_p // tile_m,)

    # Pad/cast x only when actually needed.
    xin = x if x.dtype == compute_dtype else x.astype(compute_dtype)
    if n_p != n or dims_p[0] != c_in:
        xin = jnp.pad(xin, ((0, n_p - n), (0, dims_p[0] - c_in)))

    w_elems = sum(dims_p[i] * dims_p[i + 1] for i in range(num_w))
    flops = 2 * n_p * w_elems
    bytes_accessed = (n_p * dims_p[0] * itemsize + w_elems * itemsize
                      + n_p * dims_p[-1] * out_itemsize)

    narrow = max(dims_p) <= 512
    kernel = functools.partial(_mlp_kernel, num_weights=num_w)

    def run(use_buffered):
        x_mode, w_mode = {}, {}
        if use_buffered:
            # Deeper buffering on the streamed x tiles, single buffer for the
            # VMEM-resident (constant index_map) weights.
            x_mode = dict(pipeline_mode=pl.Buffered(3 if narrow else 2))
            w_mode = dict(pipeline_mode=pl.Buffered(1))

        in_specs = [pl.BlockSpec((tile_m, dims_p[0]), lambda i: (i, 0), **x_mode)]
        for li in range(num_w):
            in_specs.append(pl.BlockSpec((dims_p[li], dims_p[li + 1]),
                                         lambda i: (0, 0), **w_mode))
        out_specs = pl.BlockSpec((tile_m, dims_p[-1]), lambda i: (i, 0))

        wb = 1 if use_buffered else 2
        xb = (3 if narrow else 2) if use_buffered else 2
        w_bytes = wb * w_elems * itemsize
        io_bytes = (xb * tile_m * dims_p[0] * itemsize
                    + 2 * tile_m * dims_p[-1] * out_itemsize)
        act_bytes = 2 * tile_m * max(dims_p) * 4       # f32 intermediates
        needed = w_bytes + io_bytes + act_bytes
        vmem_limit = int(min(max(int(1.5 * needed), 32 * 2 ** 20),
                             int(0.85 * vmem_cap)))

        return pl.pallas_call(
            kernel,
            out_shape=jax.ShapeDtypeStruct((n_p, dims_p[-1]), out_dtype),
            grid=grid,
            in_specs=in_specs,
            out_specs=out_specs,
            compiler_params=pltpu.CompilerParams(
                dimension_semantics=("parallel",),
                vmem_limit_bytes=vmem_limit),
            cost_estimate=pl.CostEstimate(
                flops=flops, bytes_accessed=bytes_accessed, transcendentals=0),
        )(xin, *w_ps)

    try:
        y_p = run(use_buffered=True)
    except Exception:
        # pipeline_mode / Buffered not supported (or rejected) on this jax:
        # fall back to default double-buffered specs.
        y_p = run(use_buffered=False)

    y = y_p
    if n_p != n or dims_p[-1] != out_dim:
        y = y[:n, :out_dim]
    if squeeze_output:
        y = jnp.squeeze(y)   # match torch .squeeze() on the (N, C, 1, 1) output
    return y


def make_architecture(input_shape, output_shape, depth, width):
    arch = [width] * depth
    arch[0] = input_shape
    arch[-1] = output_shape
    return arch


def init_weights(key, arch):
    """Deterministic init; conv1x1 in the builder is bias-free, so only W's."""
    weights = []
    for i in range(len(arch) - 1):
        key, sub = jax.random.split(key)
        w = jax.random.normal(sub, (arch[i], arch[i + 1]), dtype=jnp.float32)
        w = w * jnp.sqrt(2.0 / arch[i])
        weights.append(w)
    return weights


def _reference(x, weights, dtype):
    h = x.astype(dtype)
    for i, w in enumerate(weights):
        h = jnp.dot(h, w.astype(dtype), preferred_element_type=jnp.float32)
        if i < len(weights) - 1:
            h = jnp.maximum(h, 0.0).astype(dtype)
    return h


if __name__ == "__main__":
    # Small shapes consistent with the module's forward:
    #   x: [batch, input_shape], depth-layer MLP of bias-free conv1x1's.
    batch = 8
    input_shape = 16
    output_shape = 8
    depth = 4
    width = 32

    arch = make_architecture(input_shape, output_shape, depth, width)

    key = jax.random.PRNGKey(0)
    key, xkey = jax.random.split(key)
    x = jax.random.normal(xkey, (batch, input_shape), dtype=jnp.float32)
    weights = init_weights(key, arch)

    # Equivalent to: tabular.forward(x) == net(x[:, :, None, None]).squeeze()

    # Padding/casting hoisted out of the per-call path (done once at "init").
    prep_f32 = pad_weights(weights, compute_dtype=jnp.float32)
    prep_bf16 = pad_weights(weights, compute_dtype=jnp.bfloat16)

    # 1) f32 compute path — tight parity with a pure-JAX f32 reference.
    y_f32 = jax.block_until_ready(
        tabular_forward(x, prepared=prep_f32, out_dtype=jnp.float32))
    ref_f32 = _reference(x, weights, jnp.float32)
    assert y_f32.shape == ref_f32.shape
    assert jnp.allclose(y_f32, ref_f32, atol=1e-5, rtol=1e-5)

    # 2) Default bf16 MXU-native path (bf16 output, f32 accumulation inside).
    y_bf16 = jax.block_until_ready(tabular_forward(x, prepared=prep_bf16))
    ref_bf16 = _reference(x, weights, jnp.bfloat16).astype(jnp.bfloat16)
    assert jnp.allclose(y_bf16.astype(jnp.float32),
                        ref_bf16.astype(jnp.float32), atol=2e-2, rtol=2e-2)

    print("KERNEL_OK")
</pallas_src>

<mosaic_0001>
module attributes {stable_mosaic.version = 11 : i64} {
  func.func @_mlp_kernel(%arg0: i32, %arg1: memref<8x128xf32, #tpu.memory_space<vmem>>, %arg2: memref<128x128xf32, #tpu.memory_space<vmem>>, %arg3: memref<128x128xf32, #tpu.memory_space<vmem>>, %arg4: memref<128x128xf32, #tpu.memory_space<vmem>>, %arg5: memref<8x128xf32, #tpu.memory_space<vmem>>) attributes {dimension_semantics = [#tpu.dimension_semantics<parallel>], iteration_bounds = array<i64: 1>, scalar_prefetch = 0 : i64, scratch_operands = 0 : i64, tpu.core_type = #tpu.core_type<tc>, window_params = [{transform_indices = @transform_0, window_bounds = array<i64: 8, 128>}, {pipeline_mode = #tpu.pipeline_mode<synchronous>, transform_indices = @transform_1, window_bounds = array<i64: 128, 128>}, {pipeline_mode = #tpu.pipeline_mode<synchronous>, transform_indices = @transform_2, window_bounds = array<i64: 128, 128>}, {pipeline_mode = #tpu.pipeline_mode<synchronous>, transform_indices = @transform_3, window_bounds = array<i64: 128, 128>}, {transform_indices = @transform_4, window_bounds = array<i64: 8, 128>}]} {
    %c0 = arith.constant 0 : index
    %c0_0 = arith.constant 0 : index
    %0 = vector.load %arg1[%c0, %c0_0] : memref<8x128xf32, #tpu.memory_space<vmem>>, vector<8x128xf32>
    %c0_1 = arith.constant 0 : index
    %c0_2 = arith.constant 0 : index
    %1 = vector.load %arg2[%c0_1, %c0_2] : memref<128x128xf32, #tpu.memory_space<vmem>>, vector<128x128xf32>
    %cst = arith.constant dense<0.000000e+00> : vector<8x128xf32>
    %2 = tpu.matmul %0, %1, %cst {dimension_numbers = #tpu.dot_dimension_numbers<[1], [0], [0], [1], [0, 0, 1, 1], [], []>} : vector<8x128xf32>, vector<128x128xf32>, vector<8x128xf32> -> vector<8x128xf32>
    %cst_3 = arith.constant 0.000000e+00 : f32
    %3 = vector.broadcast %cst_3 : f32 to vector<8x128xf32>
    %4 = arith.maximumf %2, %3 : vector<8x128xf32>
    %c0_4 = arith.constant 0 : index
    %c0_5 = arith.constant 0 : index
    %5 = vector.load %arg3[%c0_4, %c0_5] : memref<128x128xf32, #tpu.memory_space<vmem>>, vector<128x128xf32>
    %cst_6 = arith.constant dense<0.000000e+00> : vector<8x128xf32>
    %6 = tpu.matmul %4, %5, %cst_6 {dimension_numbers = #tpu.dot_dimension_numbers<[1], [0], [0], [1], [0, 0, 1, 1], [], []>} : vector<8x128xf32>, vector<128x128xf32>, vector<8x128xf32> -> vector<8x128xf32>
    %cst_7 = arith.constant 0.000000e+00 : f32
    %7 = vector.broadcast %cst_7 : f32 to vector<8x128xf32>
    %8 = arith.maximumf %6, %7 : vector<8x128xf32>
    %c0_8 = arith.constant 0 : index
    %c0_9 = arith.constant 0 : index
    %9 = vector.load %arg4[%c0_8, %c0_9] : memref<128x128xf32, #tpu.memory_space<vmem>>, vector<128x128xf32>
    %cst_10 = arith.constant dense<0.000000e+00> : vector<8x128xf32>
    %10 = tpu.matmul %8, %9, %cst_10 {dimension_numbers = #tpu.dot_dimension_numbers<[1], [0], [0], [1], [0, 0, 1, 1], [], []>} : vector<8x128xf32>, vector<128x128xf32>, vector<8x128xf32> -> vector<8x128xf32>
    %c0_11 = arith.constant 0 : index
    %c0_12 = arith.constant 0 : index
    %11 = vector.load %arg5[%c0_11, %c0_12] : memref<8x128xf32, #tpu.memory_space<vmem>>, vector<8x128xf32>
    tpu.vector_store %arg5[%c0_11, %c0_12], %10 {strides = array<i32>} : memref<8x128xf32, #tpu.memory_space<vmem>>, vector<8x128xf32>,
    return
  }
  func.func @transform_0(%arg0: i32) -> (i32, i32) {
    %c0_i32 = arith.constant 0 : i32
    %c0_i32_0 = arith.constant 0 : i32
    return %arg0, %c0_i32 : i32, i32
  }
  func.func @transform_1(%arg0: i32) -> (i32, i32) {
    %c0_i32 = arith.constant 0 : i32
    %c0_i32_0 = arith.constant 0 : i32
    %c0_i32_1 = arith.constant 0 : i32
    return %c0_i32, %c0_i32_0 : i32, i32
  }
  func.func @transform_2(%arg0: i32) -> (i32, i32) {
    %c0_i32 = arith.constant 0 : i32
    %c0_i32_0 = arith.constant 0 : i32
    %c0_i32_1 = arith.constant 0 : i32
    return %c0_i32, %c0_i32_0 : i32, i32
  }
  func.func @transform_3(%arg0: i32) -> (i32, i32) {
    %c0_i32 = arith.constant 0 : i32
    %c0_i32_0 = arith.constant 0 : i32
    %c0_i32_1 = arith.constant 0 : i32
    return %c0_i32, %c0_i32_0 : i32, i32
  }
  func.func @transform_4(%arg0: i32) -> (i32, i32) {
    %c0_i32 = arith.constant 0 : i32
    %c0_i32_0 = arith.constant 0 : i32
    return %arg0, %c0_i32 : i32, i32
  }
}

</mosaic_0001>

<bundles_post_ra>
// kernel: tpu_custom_call.1
= control target key start
LH: loop header
LB: loop body
LE: loop exit
PB: predicated region body
PF: predicated region fallthrough
CT: control target
= control target key end

     0   :  { %9 = vsyncpa [#allocation3], 0  ;;  %s735_s0 = inlined_call_operand.hbm [shape: f32[8,128], index: 0, kind: input, shape index: {}]   ;;  %s736_s1 = inlined_call_operand.hbm [shape: f32[128,128], index: 1, kind: input, shape index: {}]   ;;  %s737_s2 = inlined_call_operand.hbm [shape: f32[128,128], index: 2, kind: input, shape index: {}]   ;;  %s738_s3 = inlined_call_operand.hbm [shape: f32[128,128], index: 3, kind: input, shape index: {}]   ;;  %s739_s4 = inlined_call_operand.hbm [shape: f32[8,128], index: 4, kind: output, shape index: {}]  }
   0x1   :  { %10 = vsyncpa [#allocation6], 0 }
   0x2   :  { %11 = vsyncpa [#allocation9], 0 }
   0x3   :  { %12 = vsyncpa [#allocation4], 0  ;;  %s623_s15 = smov [#allocation5]  }
   0x4   :  { %s28_s16 = sshll.u32 %s623_s15, 4  ;;  %s29_s16 = int_to_ptr.vmem [resolvable:$true] %s28_s16 }
   0x5   :  { %s523_s17 = scalar_lea.vmem %s29_s16, 2048  ;;  %p528_p1 = scmp.lt.s32.totalorder %s29_s16, %s29_s16 }
   0x6   :  { %p524_p0 = scmp.ne.s32.totalorder %s29_s16, %s523_s17  ;;  %p529_p2 = scmp.lt.s32.totalorder %s523_s17, %s523_s17 }
   0x8   :  { %p530_p3 = por %p529_p2, %p528_p1 }
   0xa   :  { %p531_p4 = pnand %p530_p3, %p524_p0 }
   0xc   :  { %534 = shalt.err (!%p531_p4)
}
   0xd   :  { %s624_s18 = smov 128   ;;  %s625_s19 = smov 8  }
   0xe   :  { %34 = dma.hbm_to_vmem [thread:$0]  %s736_s1, 2048, %s29_s16, [#allocation6], %s624_s18, %s624_s18, %s625_s19  }
   0xf   :  { %s626_s22 = smov [#allocation2]   ;;  %s627_s24 = smov [#allocation7]  }
  0x10   :  { %s19_s23 = sshll.u32 %s626_s22, 4  ;;  %s40_s25 = sshll.u32 %s627_s24, 4  ;;  %s20_s23 = int_to_ptr.vmem [resolvable:$true] %s19_s23  ;;  %s41_s25 = int_to_ptr.vmem [resolvable:$true] %s40_s25 }
  0x11   :  { %s543_s26 = scalar_lea.vmem %s20_s23, 128  ;;  %p548_p6 = scmp.lt.s32.totalorder %s20_s23, %s20_s23 }
  0x12   :  { %p544_p5 = scmp.ne.s32.totalorder %s20_s23, %s543_s26  ;;  %p549_p7 = scmp.lt.s32.totalorder %s543_s26, %s543_s26 }
  0x14   :  { %p550_p8 = por %p549_p7, %p548_p6 }
  0x16   :  { %p551_p9 = pnand %p550_p8, %p544_p5 }
  0x18   :  { %554 = shalt.err (!%p551_p9)
}
  0x19   :  { %22 = dma.hbm_to_vmem [thread:$0]  %s735_s0, 128, %s20_s23, [#allocation3]  }
  0x1a   :  { %s563_s29 = scalar_lea.vmem %s41_s25, 2048  ;;  %p568_p11 = scmp.lt.s32.totalorder %s41_s25, %s41_s25 }
  0x1b   :  { %p564_p10 = scmp.ne.s32.totalorder %s41_s25, %s563_s29  ;;  %p569_p12 = scmp.lt.s32.totalorder %s563_s29, %s563_s29 }
  0x1d   :  { %p570_p13 = por %p569_p12, %p568_p11 }
  0x1f   :  { %p571_p0 = pnand %p570_p13, %p564_p10 }
  0x21   :  { %574 = shalt.err (!%p571_p0)
}
  0x22   :  { %46 = dma.hbm_to_vmem [thread:$0]  %s737_s2, 2048, %s41_s25, [#allocation6], %s624_s18, %s624_s18, %s625_s19  }
  0x23   :  { %s628_s5 = smov [#allocation8]  }
  0x24   :  { %s52_s6 = sshll.u32 %s628_s5, 4  ;;  %s53_s6 = int_to_ptr.vmem [resolvable:$true] %s52_s6 }
  0x25   :  { %s583_s7 = scalar_lea.vmem %s53_s6, 2048  ;;  %p588_p2 = scmp.lt.s32.totalorder %s53_s6, %s53_s6 }
  0x26   :  { %p584_p1 = scmp.ne.s32.totalorder %s53_s6, %s583_s7  ;;  %p589_p3 = scmp.lt.s32.totalorder %s583_s7, %s583_s7 }
  0x28   :  { %p590_p4 = por %p589_p3, %p588_p2 }
  0x2a   :  { %p591_p5 = pnand %p590_p4, %p584_p1 }
  0x2c   :  { %594 = shalt.err (!%p591_p5)
}
  0x2d   :  { %58 = dma.hbm_to_vmem [thread:$0]  %s738_s3, 2048, %s53_s6, [#allocation9], %s624_s18, %s624_s18, %s625_s19  }
  0x2e   :  { %615 = dma.done.wait [#allocation3], 128  }
  0x2f   :  { %616 = vsyncadd [#allocation3], 4294967168 }
  0x30   :  { %617 = dma.done.wait [#allocation6], 4096  }
  0x31   :  { %618 = vsyncadd [#allocation6], 4294963200 }
  0x32   :  { %619 = dma.done.wait [#allocation9], 2048  }
  0x33   :  { %620 = vsyncadd [#allocation9], 4294965248  ;;  %v629_v0 = vmov 0.0   ;;  %vm630_vm0 = vmmov 0   ;;  %v87_v1 = vld [vmem:[#allocation5 + $0x78] sm:$0xff]  ;;  %v86_v2 = vld [vmem:[#allocation5 + $0x70] sm:$0xff] }
  0x34   :  { %401 = vmatprep.subr.mxu0 %v629_v0  ;;  %433 = vmatprep.mubr.msk.f32.mxu0 %vm630_vm0, %v629_v0  ;;  %v85_v3 = vld [vmem:[#allocation5 + $0x68] sm:$0xff]  ;;  %v84_v4 = vld [vmem:[#allocation5 + $0x60] sm:$0xff]  ;;  %v174_v5 = vld [vmem:[#allocation7 + $0x78] sm:$0xff]  ;;  %s631_s2 = smov [#allocation10]  }
  0x35   :  { %436 = vmatprep.subr.mxu1 %v629_v0  ;;  %468 = vmatprep.mubr.msk.f32.mxu1 %vm630_vm0, %v629_v0  ;;  %v83_v6 = vld [vmem:[#allocation5 + $0x58] sm:$0xff]  ;;  %v173_v7 = vld [vmem:[#allocation7 + $0x70] sm:$0xff]  ;;  %v172_v8 = vld [vmem:[#allocation7 + $0x68] sm:$0xff]  ;;  %s339_s3 = sshll.u32 %s631_s2, 4  ;;  %s340_s3 = int_to_ptr.vmem [resolvable:$true] %s339_s3 }
  0x36   :  { %402 = vmatpush3.msra.mxu0 %v87_v1  ;;  %437 = vmatpush3.msra.mxu1 %v174_v5  ;;  %v82_v9 = vld [vmem:[#allocation5 + $0x50] sm:$0xff]  ;;  %v171_v10 = vld [vmem:[#allocation7 + $0x60] sm:$0xff]  ;;  %v81_v11 = vld [vmem:[#allocation5 + $0x48] sm:$0xff]  ;;  %s595_s9 = scalar_lea.vmem %s340_s3, 128  ;;  %p600_p7 = scmp.lt.s32.totalorder %s340_s3, %s340_s3 }
  0x37   :  { %403 = vmatprep.subr.mxu0 %v629_v0  ;;  %438 = vmatprep.subr.mxu1 %v629_v0  ;;  %v170_v12 = vld [vmem:[#allocation7 + $0x58] sm:$0xff]  ;;  %v80_v13 = vld [vmem:[#allocation5 + $0x40] sm:$0xff]  ;;  %v169_v14 = vld [vmem:[#allocation7 + $0x50] sm:$0xff]  ;;  %p596_p6 = scmp.ne.s32.totalorder %s340_s3, %s595_s9  ;;  %p601_p8 = scmp.lt.s32.totalorder %s595_s9, %s595_s9 }
  0x38   :  { %404 = vmatpush3.msra.mxu0 %v86_v2  ;;  %439 = vmatpush3.msra.mxu1 %v173_v7  ;;  %v79_v15 = vld [vmem:[#allocation5 + $0x38] sm:$0xff]  ;;  %v168_v16 = vld [vmem:[#allocation7 + $0x48] sm:$0xff]  ;;  %v78_v17 = vld [vmem:[#allocation5 + $0x30] sm:$0xff] }
  0x39   :  { %405 = vmatprep.subr.mxu0 %v629_v0  ;;  %440 = vmatprep.subr.mxu1 %v629_v0  ;;  %v167_v18 = vld [vmem:[#allocation7 + $0x40] sm:$0xff]  ;;  %v77_v19 = vld [vmem:[#allocation5 + $0x28] sm:$0xff]  ;;  %v166_v20 = vld [vmem:[#allocation7 + $0x38] sm:$0xff]  ;;  %p602_p9 = por %p601_p8, %p600_p7 }
  0x3a   :  { %406 = vmatpush3.msra.mxu0 %v85_v3  ;;  %441 = vmatpush3.msra.mxu1 %v172_v8  ;;  %v76_v21 = vld [vmem:[#allocation5 + $0x20] sm:$0xff]  ;;  %v165_v22 = vld [vmem:[#allocation7 + $0x30] sm:$0xff]  ;;  %v75_v23 = vld [vmem:[#allocation5 + $0x18] sm:$0xff] }
  0x3b   :  { %407 = vmatprep.subr.mxu0 %v629_v0  ;;  %442 = vmatprep.subr.mxu1 %v629_v0  ;;  %v164_v24 = vld [vmem:[#allocation7 + $0x28] sm:$0xff]  ;;  %v74_v25 = vld [vmem:[#allocation5 + $0x10] sm:$0xff]  ;;  %v163_v26 = vld [vmem:[#allocation7 + $0x20] sm:$0xff]  ;;  %p603_p10 = pnand %p602_p9, %p596_p6 }
  0x3c   :  { %408 = vmatpush3.msra.mxu0 %v84_v4  ;;  %443 = vmatpush3.msra.mxu1 %v171_v10  ;;  %v73_v27 = vld [vmem:[#allocation5 + $0x8] sm:$0xff]  ;;  %v162_v28 = vld [vmem:[#allocation7 + $0x18] sm:$0xff]  ;;  %v72_v29 = vld [vmem:[#allocation5] sm:$0xff] }
  0x3d   :  { %409 = vmatprep.subr.mxu0 %v629_v0  ;;  %444 = vmatprep.subr.mxu1 %v629_v0  ;;  %v71_v30 = vld [vmem:[#allocation2] sm:$0xff]  ;;  %v161_v31 = vld [vmem:[#allocation7 + $0x10] sm:$0xff]  ;;  %v160_v32 = vld [vmem:[#allocation7 + $0x8] sm:$0xff] }
  0x3e   :  { %410 = vmatpush3.msra.mxu0 %v83_v6  ;;  %445 = vmatpush3.msra.mxu1 %v170_v12  ;;  %v159_v33 = vld [vmem:[#allocation7] sm:$0xff]  ;;  %v261_v34 = vld [vmem:[#allocation8 + $0x78] sm:$0xff]  ;;  %v260_v35 = vld [vmem:[#allocation8 + $0x70] sm:$0xff] }
  0x3f   :  { %411 = vmatprep.subr.mxu0 %v629_v0  ;;  %446 = vmatprep.subr.mxu1 %v629_v0  ;;  %v259_v36 = vld [vmem:[#allocation8 + $0x68] sm:$0xff]  ;;  %v258_v37 = vld [vmem:[#allocation8 + $0x60] sm:$0xff]  ;;  %v257_v38 = vld [vmem:[#allocation8 + $0x58] sm:$0xff] }
  0x40   :  { %412 = vmatpush3.msra.mxu0 %v82_v9  ;;  %447 = vmatpush3.msra.mxu1 %v169_v14  ;;  %v256_v39 = vld [vmem:[#allocation8 + $0x50] sm:$0xff]  ;;  %v255_v40 = vld [vmem:[#allocation8 + $0x48] sm:$0xff]  ;;  %v254_v41 = vld [vmem:[#allocation8 + $0x40] sm:$0xff] }
  0x41   :  { %413 = vmatprep.subr.mxu0 %v629_v0  ;;  %448 = vmatprep.subr.mxu1 %v629_v0  ;;  %v253_v42 = vld [vmem:[#allocation8 + $0x38] sm:$0xff]  ;;  %v252_v43 = vld [vmem:[#allocation8 + $0x30] sm:$0xff]  ;;  %v251_v44 = vld [vmem:[#allocation8 + $0x28] sm:$0xff] }
  0x42   :  { %414 = vmatpush3.msra.mxu0 %v81_v11  ;;  %449 = vmatpush3.msra.mxu1 %v168_v16  ;;  %v250_v45 = vld [vmem:[#allocation8 + $0x20] sm:$0xff]  ;;  %v249_v46 = vld [vmem:[#allocation8 + $0x18] sm:$0xff]  ;;  %v248_v47 = vld [vmem:[#allocation8 + $0x10] sm:$0xff] }
  0x43   :  { %415 = vmatprep.subr.mxu0 %v629_v0  ;;  %450 = vmatprep.subr.mxu1 %v629_v0  ;;  %v247_v51 = vld [vmem:[#allocation8 + $0x8] sm:$0xff]  ;;  %v246_v52 = vld [vmem:[#allocation8] sm:$0xff] }
  0x44   :  { %416 = vmatpush3.msra.mxu0 %v80_v13  ;;  %451 = vmatpush3.msra.mxu1 %v167_v18 }
  0x45   :  { %417 = vmatprep.subr.mxu0 %v629_v0  ;;  %452 = vmatprep.subr.mxu1 %v629_v0 }
  0x46   :  { %418 = vmatpush3.msra.mxu0 %v79_v15  ;;  %453 = vmatpush3.msra.mxu1 %v166_v20 }
  0x47   :  { %419 = vmatprep.subr.mxu0 %v629_v0  ;;  %454 = vmatprep.subr.mxu1 %v629_v0 }
  0x48   :  { %420 = vmatpush3.msra.mxu0 %v78_v17  ;;  %455 = vmatpush3.msra.mxu1 %v165_v22 }
  0x49   :  { %421 = vmatprep.subr.mxu0 %v629_v0  ;;  %456 = vmatprep.subr.mxu1 %v629_v0 }
  0x4a   :  { %422 = vmatpush3.msra.mxu0 %v77_v19  ;;  %457 = vmatpush3.msra.mxu1 %v164_v24 }
  0x4b   :  { %423 = vmatprep.subr.mxu0 %v629_v0  ;;  %458 = vmatprep.subr.mxu1 %v629_v0 }
  0x4c   :  { %424 = vmatpush3.msra.mxu0 %v76_v21  ;;  %459 = vmatpush3.msra.mxu1 %v163_v26 }
  0x4d   :  { %425 = vmatprep.subr.mxu0 %v629_v0  ;;  %460 = vmatprep.subr.mxu1 %v629_v0 }
  0x4e   :  { %426 = vmatpush3.msra.mxu0 %v75_v23  ;;  %461 = vmatpush3.msra.mxu1 %v162_v28 }
  0x4f   :  { %427 = vmatprep.subr.mxu0 %v629_v0  ;;  %462 = vmatprep.subr.mxu1 %v629_v0 }
  0x50   :  { %428 = vmatpush3.msra.mxu0 %v74_v25  ;;  %463 = vmatpush3.msra.mxu1 %v161_v31 }
  0x51   :  { %429 = vmatprep.subr.mxu0 %v629_v0  ;;  %464 = vmatprep.subr.mxu1 %v629_v0 }
  0x52   :  { %430 = vmatpush3.msra.mxu0 %v73_v27  ;;  %465 = vmatpush3.msra.mxu1 %v160_v32 }
  0x53   :  { %431 = vmatprep.subr.mxu0 %v629_v0  ;;  %466 = vmatprep.subr.mxu1 %v629_v0 }
  0x54   :  { %432 = vmatpush3.msra.mxu0 %v72_v29  ;;  %467 = vmatpush3.msra.mxu1 %v159_v33 }
  0x55   :  { %434 = vmatmul.mubr.f32.vlgmr.msra.gmra.mxu0 %v71_v30  ;;  %471 = vmatprep.subr.mxu0 %v629_v0 }
  0x56   :  { %503 = vmatprep.mubr.msk.f32.mxu0 %vm630_vm0, %v629_v0  ;;  %472 = vmatpush3.msra.mxu0 %v261_v34 }
  0x57   :  { %473 = vmatprep.subr.mxu0 %v629_v0 }
  0x58   :  { %474 = vmatpush3.msra.mxu0 %v260_v35 }
  0x59   :  { %475 = vmatprep.subr.mxu0 %v629_v0 }
  0x5a   :  { %476 = vmatpush3.msra.mxu0 %v259_v36 }
  0x5b   :  { %477 = vmatprep.subr.mxu0 %v629_v0 }
  0x5c   :  { %478 = vmatpush3.msra.mxu0 %v258_v37 }
  0x5d   :  { %479 = vmatprep.subr.mxu0 %v629_v0 }
  0x5e   :  { %480 = vmatpush3.msra.mxu0 %v257_v38 }
  0x5f   :  { %481 = vmatprep.subr.mxu0 %v629_v0 }
  0x60   :  { %482 = vmatpush3.msra.mxu0 %v256_v39 }
  0x61   :  { %483 = vmatprep.subr.mxu0 %v629_v0 }
  0x62   :  { %484 = vmatpush3.msra.mxu0 %v255_v40 }
  0x63   :  { %485 = vmatprep.subr.mxu0 %v629_v0 }
  0x64   :  { %486 = vmatpush3.msra.mxu0 %v254_v41 }
  0x65   :  { %487 = vmatprep.subr.mxu0 %v629_v0 }
  0x66   :  { %488 = vmatpush3.msra.mxu0 %v253_v42 }
  0x67   :  { %489 = vmatprep.subr.mxu0 %v629_v0 }
  0x68   :  { %490 = vmatpush3.msra.mxu0 %v252_v43 }
  0x69   :  { %491 = vmatprep.subr.mxu0 %v629_v0 }
  0x6a   :  { %492 = vmatpush3.msra.mxu0 %v251_v44 }
  0x6b   :  { %493 = vmatprep.subr.mxu0 %v629_v0 }
  0x6c   :  { %494 = vmatpush3.msra.mxu0 %v250_v45 }
  0x6d   :  { %495 = vmatprep.subr.mxu0 %v629_v0 }
  0x6e   :  { %496 = vmatpush3.msra.mxu0 %v249_v46 }
  0x6f   :  { %497 = vmatprep.subr.mxu0 %v629_v0 }
  0x70   :  { %498 = vmatpush3.msra.mxu0 %v248_v47 }
  0x71   :  { %499 = vmatprep.subr.mxu0 %v629_v0 }
  0x72   :  { %500 = vmatpush3.msra.mxu0 %v247_v51 }
  0x73   :  { %501 = vmatprep.subr.mxu0 %v629_v0 }
  0x74   :  { %502 = vmatpush3.msra.mxu0 %v246_v52 }
 0x115   :  { %v154_v48 = vpop.f32.mrf.mxu0 }
 0x116   :  { %v158_v49 = vmax.f32 %v154_v48, 0.0 }
 0x117   :  { %v435_v50 = vpop.f32.mrf.mxu0 }
 0x118   :  { %469 = vmatmul.mubr.f32.vlgmr.msra.gmra.mxu1 %v158_v49 }
 0x1d8   :  { %v241_v53 = vpop.f32.mrf.mxu1 }
 0x1d9   :  { %v245_v54 = vmax.f32 %v241_v53, 0.0 }
 0x1da   :  { %v470_v55 = vpop.f32.mrf.mxu1 }
 0x1db   :  { %504 = vmatmul.mubr.f32.vlgmr.msra.gmra.mxu0 %v245_v54 }
 0x29b   :  { %v328_v56 = vpop.f32.mrf.mxu0 }
 0x29c   :  { %332 = vst [vmem:[#allocation10] sm:$0xff] %v328_v56 }
 0x29d   :  { %v505_v57 = vpop.f32.mrf.mxu0 }
 0x29e   :  { %606 = shalt.err (!%p603_p10)
}
 0x29f   :  { %342 = dma.vmem_to_hbm [thread:$0]  %s340_s3, 128, %s739_s4, [#allocation4]  }
 0x2a0   :  { %621 = dma.done.wait [#allocation4], 128  }
 0x2a1   :  { %622 = vsyncadd [#allocation4], 4294967168 }
 0x2a2   :  { %346 = vsyncpa [#allocation3], 1 }
 0x2a3   :  { %347 = vsyncpa [#allocation6], 1 }
 0x2a4   :  { %348 = vsyncpa [#allocation9], 1 }
 0x2a5   :  { %349 = vsyncpa [#allocation4], 1 }

</bundles_post_ra>
